<compile_context>
chip_gen: v7x
topology: tpu7x:2x2x1
jax: 0.10.0
libtpu: 0.0.40
codegen_flags: <defaults>
</compile_context>

<pallas_src>
import jax
import jax.numpy as jnp
from jax.experimental import pallas as pl


# ----------------------------------------------------------------------------- kernel

def patent_head_gemv_kernel(x_ref, v_ref, c_ref, o_ref):
    """Folded 'concat'-fusion head on CLS rows: logits = x @ v + c.

    x_ref : (Bp, 3H) f32   [cls_h | cls_fac | cls_lin], Bp = B padded to multiple of 8
    v_ref : (1, 3H)  f32   folded weight vector (row layout for lane-wise broadcast)
    c_ref : (1, 1)   f32   folded bias
    o_ref : (Bp, 1)  f32   logits
    """
    # VPU multiply (sublane-broadcast of v across rows) + XLU lane reduction.
    o_ref[...] = jnp.sum(x_ref[...] * v_ref[...], axis=-1, keepdims=True) + c_ref[...]


# ------------------------------------------------------------------- offline weight fold

def fold_patent_head_params(params):
    """Fold the fully-affine inference head into a single (3H,1) GEMV + scalar bias.

    Call ONCE at checkpoint-load time (not per forward).  Exact at inference
    (no nonlinearity anywhere; dropout is identity when labels is None).
    """
    hp = jax.lax.Precision.HIGHEST  # done once; keep the fold numerically faithful
    f32 = jnp.float32
    wfh, wfa = params['wfh'].astype(f32), params['wfa'].astype(f32)
    wlh, wla = params['wlh'].astype(f32), params['wla'].astype(f32)
    wth, wta = params['wth'].astype(f32), params['wta'].astype(f32)
    bf, bl, bt = params['bf'].astype(f32), params['bl'].astype(f32), params['bt'].astype(f32)
    wc, bc = params['wc'].astype(f32), params['bc'].astype(f32)

    u_fac = jnp.dot(wth, wc, precision=hp)                      # (H, 1)
    u_lin = jnp.dot(wta, wc, precision=hp)                      # (H, 1)
    v = jnp.concatenate([
        jnp.dot(wfh, u_fac, precision=hp) + jnp.dot(wlh, u_lin, precision=hp),  # h
        jnp.dot(wfa, u_fac, precision=hp),                                       # fac
        jnp.dot(wla, u_lin, precision=hp),                                       # lin
    ], axis=0)                                                   # (3H, 1)
    c = (jnp.dot(bf, u_fac, precision=hp)
         + jnp.dot(bl, u_lin, precision=hp)
         + jnp.dot(bt, wc, precision=hp)
         + bc)                                                   # (1, 1)
    return v, c


# ----------------------------------------------------------------------------- wrapper

def patent_forward(h, fac_out, lin_out, folded):
    """Inference forward of patentModel (fusion_mode='concat', labels=None).

    h, fac_out, lin_out : (B, S, H) last-hidden-states and adapter outputs.
    folded              : (v, c) from fold_patent_head_params (precomputed offline).
    Returns logits of shape (B,) — matches reshaped_logits.squeeze(dim=1).
    """
    v, c = folded
    B, S, H = h.shape
    assert v.shape == (3 * H, 1) and c.shape == (1, 1)

    # CLS-only slice + concat: only (B, 3H) activation rows ever reach the kernel.
    x = jnp.concatenate([h[:, 0, :], fac_out[:, 0, :], lin_out[:, 0, :]],
                        axis=1).astype(jnp.float32)              # (B, 3H)

    # Pad batch rows to the f32 sublane multiple (8); nothing else needs tiling.
    Bp = ((B + 7) // 8) * 8
    if Bp != B:
        x = jnp.pad(x, ((0, Bp - B), (0, 0)))

    v_row = v.T.astype(jnp.float32)                              # (1, 3H)
    c = c.astype(jnp.float32)                                    # (1, 1)

    full = lambda a: pl.BlockSpec(a.shape, lambda: (0,) * a.ndim)
    out = pl.pallas_call(
        patent_head_gemv_kernel,
        out_shape=jax.ShapeDtypeStruct((Bp, 1), jnp.float32),
        in_specs=[full(x), full(v_row), full(c)],
        out_specs=pl.BlockSpec((Bp, 1), lambda: (0, 0)),
        # Grid-less; total footprint < 1 MiB even at H=1024, so no VMEM override needed
        # on any generation (v5e 16 MiB scoped default included).
    )(x, v_row, c)
    return out[:B, 0]


# ---------------------------------------------------------------------------- reference

def patent_forward_ref(h, fac, lin, p):
    """Pure-JAX f32 reference matching the PyTorch module semantics (inference path)."""
    hp = jax.lax.Precision.HIGHEST
    dot = lambda a, b: jnp.dot(a, b, precision=hp)
    fac_feat = dot(h, p['wfh']) + dot(fac, p['wfa']) + p['bf'][0]
    lin_feat = dot(h, p['wlh']) + dot(lin, p['wla']) + p['bl'][0]
    task = dot(fac_feat, p['wth']) + dot(lin_feat, p['wta']) + p['bt'][0]
    return (dot(task[:, 0, :], p['wc']) + p['bc'][0])[:, 0]


# --------------------------------------------------------------------------------- main

if __name__ == "__main__":
    B, S, H = 2, 8, 32  # batch, seq, hidden_size (real model: H=768/1024, S=512)
    key = jax.random.PRNGKey(0)
    ks = jax.random.split(key, 14)

    # "Pretrained model" last hidden states and adapter outputs (the adapters are
    # external submodules in the original code; modeled here as kernel inputs).
    h = jax.random.normal(ks[0], (B, S, H), jnp.float32)
    fac_out = jax.random.normal(ks[1], (B, S, H), jnp.float32)
    lin_out = jax.random.normal(ks[2], (B, S, H), jnp.float32)

    init = lambda k, shape: jax.random.normal(k, shape, jnp.float32) * (H ** -0.5)
    params = {
        # task_dense_fac: Linear(2H -> H), split into its two (H, H) halves: [h | fac]
        'wfh': init(ks[3], (H, H)), 'wfa': init(ks[4], (H, H)), 'bf': init(ks[5], (1, H)),
        # task_dense_lin: Linear(2H -> H): [h | lin]
        'wlh': init(ks[6], (H, H)), 'wla': init(ks[7], (H, H)), 'bl': init(ks[8], (1, H)),
        # task_dense: Linear(2H -> H): [fac_features | lin_features]
        'wth': init(ks[9], (H, H)), 'wta': init(ks[10], (H, H)), 'bt': init(ks[11], (1, H)),
        # classifier: Linear(H -> 1)
        'wc': init(ks[12], (H, 1)), 'bc': init(ks[13], (1, 1)),
    }

    # Offline (once per checkpoint): fold the affine head into a single GEMV.
    folded = jax.tree_util.tree_map(jax.block_until_ready,
                                    fold_patent_head_params(params))

    logits = patent_forward(h, fac_out, lin_out, folded)
    jax.block_until_ready(logits)

    ref = patent_forward_ref(h, fac_out, lin_out, params)
    assert logits.shape == (B,), logits.shape
    # f32 end-to-end; only summation reordering differs from the reference.
    assert jnp.allclose(logits, ref, atol=1e-3, rtol=1e-3), (logits, ref)

    print("KERNEL_OK")
</pallas_src>

<mosaic_0001>
module attributes {stable_mosaic.version = 11 : i64} {
  func.func @patent_head_gemv_kernel(%arg0: memref<8x96xf32, #tpu.memory_space<vmem>>, %arg1: memref<1x96xf32, #tpu.memory_space<vmem>>, %arg2: memref<1x1xf32, #tpu.memory_space<vmem>>, %arg3: memref<8x1xf32, #tpu.memory_space<vmem>>) attributes {dimension_semantics = [], scalar_prefetch = 0 : i64, scratch_operands = 0 : i64, tpu.core_type = #tpu.core_type<tc>} {
    %c0 = arith.constant 0 : index
    %c0_0 = arith.constant 0 : index
    %0 = vector.load %arg0[%c0, %c0_0] : memref<8x96xf32, #tpu.memory_space<vmem>>, vector<8x96xf32>
    %c0_1 = arith.constant 0 : index
    %c0_2 = arith.constant 0 : index
    %1 = vector.load %arg1[%c0_1, %c0_2] : memref<1x96xf32, #tpu.memory_space<vmem>>, vector<1x96xf32>
    %2 = vector.broadcast %1 : vector<1x96xf32> to vector<8x96xf32>
    %3 = arith.mulf %0, %2 : vector<8x96xf32>
    %cst = arith.constant dense<0.000000e+00> : vector<8xf32>
    %4 = vector.multi_reduction <add>, %3, %cst [1] : vector<8x96xf32> to vector<8xf32>
    %5 = vector.shape_cast %4 : vector<8xf32> to vector<8x1xf32>
    %c0_3 = arith.constant 0 : index
    %c0_4 = arith.constant 0 : index
    %6 = vector.load %arg2[%c0_3, %c0_4] : memref<1x1xf32, #tpu.memory_space<vmem>>, vector<1x1xf32>
    %7 = vector.broadcast %6 : vector<1x1xf32> to vector<8x1xf32>
    %8 = arith.addf %5, %7 : vector<8x1xf32>
    %c0_5 = arith.constant 0 : index
    %c0_6 = arith.constant 0 : index
    %9 = vector.load %arg3[%c0_5, %c0_6] : memref<8x1xf32, #tpu.memory_space<vmem>>, vector<8x1xf32>
    tpu.vector_store %arg3[%c0_5, %c0_6], %8 {strides = array<i32>} : memref<8x1xf32, #tpu.memory_space<vmem>>, vector<8x1xf32>,
    return
  }
}

</mosaic_0001>

<bundles_post_ra>
// kernel: tpu_custom_call.1
= control target key start
LH: loop header
LB: loop body
LE: loop exit
PB: predicated region body
PF: predicated region fallthrough
CT: control target
= control target key end

     0   :  { %s125_s0 = inlined_call_operand.hbm [shape: f32[8,96], index: 0, kind: input, shape index: {}]   ;;  %s126_s1 = inlined_call_operand.vmem [shape: f32[1,96], index: 1, kind: input, shape index: {}]   ;;  %s127_s2 = inlined_call_operand.<no memory space> [shape: f32[1,1], index: 2, kind: input, shape index: {}]   ;;  %s128_s3 = inlined_call_operand.vmem [shape: f32[8,1], index: 3, kind: output, shape index: {}]  }
   0x1   :  { %v8_v0 = vstv %s127_s2 }
   0x2   :  { %9 = vst [vmem:[#allocation2] sm:$0x1] %v8_v0 }
   0x3   :  { %10 = vsyncpa [#allocation4], 0  ;;  %s83_s14 = smov [#allocation3]   ;;  %s59_s18 = scalar_lea.hbm %s125_s0, 128 }
   0x4   :  { %s17_s15 = sshll.u32 %s83_s14, 4  ;;  %p60_p0 = scmp.ne.s32.totalorder %s125_s0, %s59_s18  ;;  %s18_s15 = int_to_ptr.vmem [resolvable:$true] %s17_s15 }
   0x5   :  { %p63_p1 = scmp.lt.u32.totalorder %s59_s18, %s125_s0 }
   0x7   :  { %p65_p2 = pnand %p63_p1, %p60_p0 }
   0x9   :  { %68 = shalt.err (!%p65_p2)
}
   0xa   :  { %s69_s2 = scalar_lea.vmem %s18_s15, 128  ;;  %p74_p4 = scmp.lt.s32.totalorder %s18_s15, %s18_s15 }
   0xb   :  { %p70_p3 = scmp.ne.s32.totalorder %s18_s15, %s69_s2  ;;  %p75_p5 = scmp.lt.s32.totalorder %s69_s2, %s69_s2 }
   0xd   :  { %p76_p6 = por %p75_p5, %p74_p4 }
   0xf   :  { %p77_p7 = pnand %p76_p6, %p70_p3 }
  0x11   :  { %80 = shalt.err (!%p77_p7)
}
  0x12   :  { %20 = dma.hbm_to_vmem [thread:$0]  %s125_s0, 128, %s18_s15, [#allocation4]  }
  0x13   :  { %81 = dma.done.wait [#allocation4], 128  }
  0x14   :  { %82 = vsyncadd [#allocation4], 4294967168  ;;  %v28_v1 = vld [vmem:[#allocation3] sm:$0xff]  ;;  %v56_v2 = vld [vmem:[%s126_s1] ss:$0 sm:$0xff]  ;;  %vm37_vm0 = vcmask 785408  }
  0x15   :  { %v36_v3 = vmul.f32 %v56_v2, %v28_v1  ;;  %v57_v5 = vld [vmem:[#allocation2] ss:$0 sm:$0xff]  ;;  %vm49_vm1 = vcmask 7168  }
  0x17   :  { %v38_v4 = vsel %vm37_vm0, %v36_v3, 0.0 }
  0x18   :  { %39 = vadd.xlane.f32.xlu0 %v38_v4 }
  0xa5   :  { %v40_v6 = vpop.xlane.xlu0 %39 }
  0xa6   :  { %v48_v7 = vadd.f32 %v57_v5, %v40_v6 }
  0xa8   :  { %50 = vst.msk [vmem:[%s128_s3] sm:$0xff] %vm49_vm1, %v48_v7 }
  0xa9   :  { %55 = vsyncpa [#allocation4], 1 }

</bundles_post_ra>
